<compile_context>
chip_gen: v6e
topology: v6e:2x2x1
jax: 0.10.0
libtpu: 0.0.40
codegen_flags: <defaults>
</compile_context>

<pallas_src>
import math
from functools import partial

import jax
import jax.numpy as jnp
from jax.experimental import pallas as pl
from jax.experimental.pallas import tpu as pltpu

BN_EPS = 1e-5


def _stats_kernel(p_ref, g_ref):
    # p_ref: (Kc, T) dot-dtype patches for one (batch, tile) grid step.
    # g_ref: (Kc+1, Kc+1) f32 augmented Gram [[p p^T, p 1], [1 p^T, T]].
    p = p_ref[...]
    ones = jnp.ones((1, p.shape[1]), dtype=p.dtype)
    pa = jnp.concatenate([p, ones], axis=0)                     # (Kc+1, T)
    g_ref[...] = jax.lax.dot_general(
        pa, pa, (((1,), (1,)), ((), ())),                       # contract lane dims
        preferred_element_type=jnp.float32)


def _apply_kernel(p_ref, w_ref, ss_ref, o_ref):
    # Recompute the (cheap, Kc-wide) conv tile and apply folded BN: y*scale+shift.
    y = jnp.dot(w_ref[...], p_ref[...], preferred_element_type=jnp.float32)  # (E, T)
    scale = ss_ref[:, 0:1]
    shift = ss_ref[:, 1:2]
    o_ref[...] = (y * scale + shift).astype(o_ref.dtype)


def _im2col(x, kernel_size, stride, pad, l_padded, dot_dtype):
    """(B, C, L) -> (B, C*K, l_padded) patches, zero-padded, in dot_dtype.

    Built from K strided slices (no advanced-index gather); the right-pad and
    dtype cast are part of the same expression so XLA fuses the producer into
    a single pass over x.  Padded columns are exactly zero.
    """
    B, C, L = x.shape
    need = (l_padded - 1) * stride + kernel_size
    extra = max(0, need - (L + 2 * pad))
    x_pad = jnp.pad(x, ((0, 0), (0, 0), (pad, pad + extra)))
    taps = [
        jax.lax.slice(x_pad, (0, 0, k),
                      (B, C, k + (l_padded - 1) * stride + 1),
                      (1, 1, stride))
        for k in range(kernel_size)
    ]                                                           # K x (B, C, l_padded)
    patches = jnp.stack(taps, axis=2).reshape(B, C * kernel_size, l_padded)
    return patches.astype(dot_dtype)


def overlap_patch_embed(x, conv_w, conv_b, bn_gamma, bn_beta, *,
                        kernel_size=7, stride=4, l_tile=4096,
                        dot_dtype=jnp.bfloat16, out_dtype=jnp.float32):
    """x: (B, C_in, L) float32 -> (B, embed_dim, L_out), Conv1d + train-mode BN."""
    # conv_b is intentionally unused: a per-channel constant bias is exactly
    # cancelled by the training-mode BatchNorm mean subtraction.
    del conv_b

    assert l_tile % 128 == 0, "l_tile must be a multiple of 128 (lane width)"

    B, C_in, L = x.shape
    E = conv_w.shape[0]
    Kc = C_in * kernel_size
    pad = kernel_size // 2
    L_out = (L + 2 * pad - kernel_size) // stride + 1

    # Lane tiling: tile is always a multiple of 128 (unmasked main-path stores);
    # patches are zero-padded up to l_padded, and padded columns contribute
    # exactly 0 to the stats because the conv bias is elided.
    l_128 = -(-L_out // 128) * 128
    tile = min(l_tile, l_128)
    l_padded = -(-L_out // tile) * tile
    n_tiles = l_padded // tile

    patches = _im2col(x, kernel_size, stride, pad, l_padded, dot_dtype)   # (B, Kc, l_padded)
    w_t = conv_w.reshape(E, Kc).astype(dot_dtype)                         # same (c, k) flatten order

    grid = (B, n_tiles)
    dims = ("parallel", "parallel")      # disjoint outputs on both passes; keep
                                         # B * n_tiles >= 2 for v7x's 2 TensorCores
    patch_bytes = patches.size * patches.dtype.itemsize
    p_spec = pl.BlockSpec((None, Kc, tile), lambda b, j: (b, 0, j))

    # ---- pass 1: per-tile augmented patch Gram (MXU, f32 accumulation) ----
    gram = pl.pallas_call(
        _stats_kernel,
        out_shape=jax.ShapeDtypeStruct((B, n_tiles, Kc + 1, Kc + 1), jnp.float32),
        grid=grid,
        in_specs=[p_spec],
        out_specs=pl.BlockSpec((None, None, Kc + 1, Kc + 1),
                               lambda b, j: (b, j, 0, 0)),
        compiler_params=pltpu.CompilerParams(dimension_semantics=dims),
        cost_estimate=pl.CostEstimate(
            flops=2 * B * l_padded * (Kc + 1) ** 2, transcendentals=0,
            bytes_accessed=patch_bytes + B * n_tiles * (Kc + 1) ** 2 * 4),
    )(patches)

    # ---- tiny O(E*Kc^2) stat merge + BN coefficient folding (plain XLA) ----
    g = jnp.sum(gram, axis=(0, 1))                 # (Kc+1, Kc+1)
    s = g[Kc, :Kc]                                 # sum_j p_j            (Kc,)
    G = g[:Kc, :Kc]                                # sum_j p_j p_j^T      (Kc, Kc)
    w_f = w_t.astype(jnp.float32)                  # bf16-rounded weights, f32
    m_true = float(B * L_out)                      # padded columns are exact zeros
    mean = (w_f @ s) / m_true                                 # E[y]   per channel
    msq = jnp.sum((w_f @ G) * w_f, axis=1) / m_true           # E[y^2] per channel
    var = jnp.maximum(msq - mean * mean, 0.0)
    # TODO(synk): E[y^2]-E[y]^2 in f32 is cancellation-prone for very large
    # B*L_out with |mean| >> std; a centered second stats pass would be safer.
    inv = jax.lax.rsqrt(var + BN_EPS)
    scale = bn_gamma.astype(jnp.float32) * inv
    shift = bn_beta.astype(jnp.float32) - mean * scale
    ss = jnp.stack([scale, shift], axis=1)         # (E, 2) folded BN coefficients
    # TODO(synk): nn.BatchNorm1d running_mean/running_var buffer updates are
    # stateful bookkeeping and are not materialized here.

    # ---- pass 2: recompute conv tile, apply y*scale+shift, write (B, E, L_out) ----
    # Output is emitted at its true extent; the last (or only) tile is
    # boundary-masked by Pallas, so there is no post-kernel slice / extra HBM pass.
    out = pl.pallas_call(
        _apply_kernel,
        out_shape=jax.ShapeDtypeStruct((B, E, L_out), out_dtype),
        grid=grid,
        in_specs=[p_spec,
                  pl.BlockSpec((E, Kc), lambda b, j: (0, 0)),
                  pl.BlockSpec((E, 2), lambda b, j: (0, 0))],
        out_specs=pl.BlockSpec((None, E, tile), lambda b, j: (b, 0, j)),
        compiler_params=pltpu.CompilerParams(dimension_semantics=dims),
        cost_estimate=pl.CostEstimate(
            flops=2 * B * l_padded * Kc * E, transcendentals=0,
            bytes_accessed=patch_bytes
            + B * E * L_out * jnp.dtype(out_dtype).itemsize),
    )(patches, w_t, ss)
    return out


def init_params(key, *, in_chans=2, embed_dim=64, kernel_size=7):
    # Matches OverlapPatchEmbed._init_weights for Conv1d:
    #   weight ~ N(0, sqrt(2 / fan_out)), fan_out = kernel_size * out_channels
    #   bias = 0 ; BatchNorm1d: gamma = 1, beta = 0 (PyTorch defaults).
    fan_out = kernel_size * embed_dim
    std = math.sqrt(2.0 / fan_out)
    conv_w = std * jax.random.normal(key, (embed_dim, in_chans, kernel_size),
                                     dtype=jnp.float32)
    conv_b = jnp.zeros((embed_dim,), jnp.float32)
    bn_gamma = jnp.ones((embed_dim,), jnp.float32)
    bn_beta = jnp.zeros((embed_dim,), jnp.float32)
    return conv_w, conv_b, bn_gamma, bn_beta


def _reference(x, conv_w, conv_b, gamma, beta, *, stride, pad):
    """Pure-JAX reference: Conv1d + training-mode BatchNorm1d (f32)."""
    y = jax.lax.conv_general_dilated(
        x, conv_w, window_strides=(stride,), padding=[(pad, pad)],
        dimension_numbers=("NCH", "OIH", "NCH"),
        precision=jax.lax.Precision.HIGHEST)
    y = y + conv_b[None, :, None]
    mean = jnp.mean(y, axis=(0, 2), keepdims=True)
    var = jnp.mean((y - mean) ** 2, axis=(0, 2), keepdims=True)
    return ((y - mean) * jax.lax.rsqrt(var + BN_EPS)
            * gamma[None, :, None] + beta[None, :, None])


if __name__ == "__main__":
    key = jax.random.PRNGKey(0)
    k_w, k_x1, k_x2 = jax.random.split(key, 3)

    embed_dim, in_chans, kernel_size, stride = 64, 2, 7, 4
    pad = kernel_size // 2
    conv_w, conv_b, bn_gamma, bn_beta = init_params(
        k_w, in_chans=in_chans, embed_dim=embed_dim, kernel_size=kernel_size)

    fwd = jax.jit(partial(overlap_patch_embed,
                          kernel_size=kernel_size, stride=stride))

    # Module-default signal length (1024 -> L_out=256, exact 128-lane tiles),
    # plus a non-aligned length (200 -> L_out=50) exercising the boundary-masked
    # output tile.
    for B, L, k_x in ((2, 1024, k_x1), (2, 200, k_x2)):
        x = jax.random.normal(k_x, (B, in_chans, L), dtype=jnp.float32)
        y = jax.block_until_ready(fwd(x, conv_w, conv_b, bn_gamma, bn_beta))

        L_out = (L + 2 * pad - kernel_size) // stride + 1
        assert y.shape == (B, embed_dim, L_out), y.shape
        assert bool(jnp.all(jnp.isfinite(y)))

        y_ref = _reference(x, conv_w, conv_b, bn_gamma, bn_beta,
                           stride=stride, pad=pad)
        max_err = float(jnp.max(jnp.abs(y - y_ref)))
        assert max_err < 0.1, f"L={L}: max abs error vs reference: {max_err}"  # bf16 dot inputs

    print("KERNEL_OK")
</pallas_src>

<mosaic_0001>
module attributes {stable_mosaic.version = 11 : i64} {
  func.func @_stats_kernel(%arg0: i32, %arg1: i32, %arg2: memref<1x14x256xbf16, #tpu.memory_space<vmem>>, %arg3: memref<1x1x15x15xf32, #tpu.memory_space<vmem>>) attributes {dimension_semantics = [#tpu.dimension_semantics<parallel>, #tpu.dimension_semantics<parallel>], iteration_bounds = array<i64: 2, 1>, scalar_prefetch = 0 : i64, scratch_operands = 0 : i64, tpu.core_type = #tpu.core_type<tc>, window_params = [{transform_indices = @transform_0, window_bounds = array<i64: 1, 14, 256>}, {transform_indices = @transform_1, window_bounds = array<i64: 1, 1, 15, 15>}]} {
    %c0 = arith.constant 0 : index
    %c0_0 = arith.constant 0 : index
    %c0_1 = arith.constant 0 : index
    %0 = vector.load %arg2[%c0, %c0_0, %c0_1] : memref<1x14x256xbf16, #tpu.memory_space<vmem>>, vector<1x14x256xbf16>
    %1 = vector.shape_cast %0 : vector<1x14x256xbf16> to vector<14x256xbf16>
    %cst = arith.constant 1.000000e+00 : bf16
    %2 = vector.broadcast %cst : bf16 to vector<1x256xbf16>
    %3 = tpu.concatenate %1, %2 in 0 : vector<14x256xbf16>, vector<1x256xbf16> -> vector<15x256xbf16>
    %cst_2 = arith.constant dense<0.000000e+00> : vector<15x15xf32>
    %4 = tpu.matmul %3, %3, %cst_2 {dimension_numbers = #tpu.dot_dimension_numbers<[1], [1], [0], [0], [0, 0, 1, 0], [], []>} : vector<15x256xbf16>, vector<15x256xbf16>, vector<15x15xf32> -> vector<15x15xf32>
    %c0_3 = arith.constant 0 : index
    %c0_4 = arith.constant 0 : index
    %c0_5 = arith.constant 0 : index
    %c0_6 = arith.constant 0 : index
    %5 = vector.load %arg3[%c0_3, %c0_4, %c0_5, %c0_6] : memref<1x1x15x15xf32, #tpu.memory_space<vmem>>, vector<1x1x15x15xf32>
    %6 = vector.shape_cast %5 : vector<1x1x15x15xf32> to vector<15x15xf32>
    %7 = vector.shape_cast %4 : vector<15x15xf32> to vector<1x1x15x15xf32>
    tpu.vector_store %arg3[%c0_3, %c0_4, %c0_5, %c0_6], %7 {strides = array<i32>} : memref<1x1x15x15xf32, #tpu.memory_space<vmem>>, vector<1x1x15x15xf32>,
    return
  }
  func.func @transform_0(%arg0: i32, %arg1: i32) -> (i32, i32, i32) {
    %c0_i32 = arith.constant 0 : i32
    %c0_i32_0 = arith.constant 0 : i32
    return %arg0, %c0_i32, %arg1 : i32, i32, i32
  }
  func.func @transform_1(%arg0: i32, %arg1: i32) -> (i32, i32, i32, i32) {
    %c0_i32 = arith.constant 0 : i32
    %c0_i32_0 = arith.constant 0 : i32
    %c0_i32_1 = arith.constant 0 : i32
    return %arg0, %arg1, %c0_i32, %c0_i32_0 : i32, i32, i32, i32
  }
}

module attributes {stable_mosaic.version = 11 : i64} {
  func.func @_apply_kernel(%arg0: i32, %arg1: i32, %arg2: memref<1x14x256xbf16, #tpu.memory_space<vmem>>, %arg3: memref<64x14xbf16, #tpu.memory_space<vmem>>, %arg4: memref<64x2xf32, #tpu.memory_space<vmem>>, %arg5: memref<1x64x256xf32, #tpu.memory_space<vmem>>) attributes {dimension_semantics = [#tpu.dimension_semantics<parallel>, #tpu.dimension_semantics<parallel>], iteration_bounds = array<i64: 2, 1>, scalar_prefetch = 0 : i64, scratch_operands = 0 : i64, tpu.core_type = #tpu.core_type<tc>, window_params = [{transform_indices = @transform_0, window_bounds = array<i64: 1, 14, 256>}, {pipeline_mode = #tpu.pipeline_mode<synchronous>, transform_indices = @transform_1, window_bounds = array<i64: 64, 14>}, {pipeline_mode = #tpu.pipeline_mode<synchronous>, transform_indices = @transform_2, window_bounds = array<i64: 64, 2>}, {transform_indices = @transform_3, window_bounds = array<i64: 1, 64, 256>}]} {
    %c0 = arith.constant 0 : index
    %c0_0 = arith.constant 0 : index
    %0 = vector.load %arg3[%c0, %c0_0] : memref<64x14xbf16, #tpu.memory_space<vmem>>, vector<64x14xbf16>
    %c0_1 = arith.constant 0 : index
    %c0_2 = arith.constant 0 : index
    %c0_3 = arith.constant 0 : index
    %1 = vector.load %arg2[%c0_1, %c0_2, %c0_3] : memref<1x14x256xbf16, #tpu.memory_space<vmem>>, vector<1x14x256xbf16>
    %2 = vector.shape_cast %1 : vector<1x14x256xbf16> to vector<14x256xbf16>
    %cst = arith.constant dense<0.000000e+00> : vector<64x256xf32>
    %3 = tpu.matmul %0, %2, %cst {dimension_numbers = #tpu.dot_dimension_numbers<[1], [0], [0], [1], [0, 0, 1, 1], [], []>} : vector<64x14xbf16>, vector<14x256xbf16>, vector<64x256xf32> -> vector<64x256xf32>
    %c0_4 = arith.constant 0 : index
    %c0_5 = arith.constant 0 : index
    %4 = vector.load %arg4[%c0_4, %c0_5] : memref<64x2xf32, #tpu.memory_space<vmem>>, vector<64x1xf32>
    %c0_6 = arith.constant 0 : index
    %c1 = arith.constant 1 : index
    %5 = vector.load %arg4[%c0_6, %c1] : memref<64x2xf32, #tpu.memory_space<vmem>>, vector<64x1xf32>
    %6 = vector.broadcast %4 : vector<64x1xf32> to vector<64x256xf32>
    %7 = arith.mulf %3, %6 : vector<64x256xf32>
    %8 = vector.broadcast %5 : vector<64x1xf32> to vector<64x256xf32>
    %9 = arith.addf %7, %8 : vector<64x256xf32>
    %c0_7 = arith.constant 0 : index
    %c0_8 = arith.constant 0 : index
    %c0_9 = arith.constant 0 : index
    %10 = vector.load %arg5[%c0_7, %c0_8, %c0_9] : memref<1x64x256xf32, #tpu.memory_space<vmem>>, vector<1x64x256xf32>
    %11 = vector.shape_cast %10 : vector<1x64x256xf32> to vector<64x256xf32>
    %12 = vector.shape_cast %9 : vector<64x256xf32> to vector<1x64x256xf32>
    tpu.vector_store %arg5[%c0_7, %c0_8, %c0_9], %12 {strides = array<i32>} : memref<1x64x256xf32, #tpu.memory_space<vmem>>, vector<1x64x256xf32>,
    return
  }
  func.func @transform_0(%arg0: i32, %arg1: i32) -> (i32, i32, i32) {
    %c0_i32 = arith.constant 0 : i32
    %c0_i32_0 = arith.constant 0 : i32
    return %arg0, %c0_i32, %arg1 : i32, i32, i32
  }
  func.func @transform_1(%arg0: i32, %arg1: i32) -> (i32, i32) {
    %c0_i32 = arith.constant 0 : i32
    %c0_i32_0 = arith.constant 0 : i32
    %c0_i32_1 = arith.constant 0 : i32
    return %c0_i32, %c0_i32_0 : i32, i32
  }
  func.func @transform_2(%arg0: i32, %arg1: i32) -> (i32, i32) {
    %c0_i32 = arith.constant 0 : i32
    %c0_i32_0 = arith.constant 0 : i32
    %c0_i32_1 = arith.constant 0 : i32
    return %c0_i32, %c0_i32_0 : i32, i32
  }
  func.func @transform_3(%arg0: i32, %arg1: i32) -> (i32, i32, i32) {
    %c0_i32 = arith.constant 0 : i32
    %c0_i32_0 = arith.constant 0 : i32
    return %arg0, %c0_i32, %arg1 : i32, i32, i32
  }
}

</mosaic_0001>

<bundles_post_ra>
// kernel: overlap_patch_embed.2
= control target key start
LH: loop header
LB: loop body
LE: loop exit
PB: predicated region body
PF: predicated region fallthrough
CT: control target
= control target key end

     0   :  { %s385_s6 = smov 0   ;;  %s387_s7 = smov 0   ;;  %s415_s0 = inlined_call_operand.vmem [shape: bf16[2,14,256], index: 0, kind: input, shape index: {}]   ;;  %s416_s1 = inlined_call_operand.vmem [shape: f32[2,1,15,15], index: 1, kind: output, shape index: {}]  }
   0x1   :  { %s389_s8 = smov 0  }
   0x2 LB: > { %s23_s9 = sadd.s32 1, %s369_s7  ;;  %p313_p0 = scmp.ge.s32.totalorder %s373_s8, 1  ;;  %s373_s8 = sphi %s389_s8, %s11_s8   ;;  %s369_s7 = sphi %s387_s7, %s418_s7   ;;  %s365_s6 = sphi %s385_s6, %s417_s6  }
   0x3   : > { %p25_p1 = scmp.ge.s32.totalorder %s23_s9, 2  ;;  %p108_p2 = scmp.lt.s32.totalorder %s373_s8, 3 }
   0x5   : > { %s420_s9 = smov (%p25_p1, %s23_s9), 0  ;;  %p109_p3 = pnand %p313_p0, %p108_p2 }
   0x6   : > { %p137_p4 = scmp.lt.s32.totalorder (!%p109_p3), %s365_s6, 1 }
   0x7   : > { %112 = sbr.rel (%p109_p3) target bundleno = 224 (0xe0), region = 24 }
   0xc   : > { %s422_s6 = smov (!%p137_p4, %s365_s6), 1  ;;  %vm167_vm0 = vcmask 1046528   ;;  %vm216_vm1 = vcmask 121856   ;;  %vm218_vm2 = vcmask 120832  }
   0xd   : > { %s322_s10 = sshll.u32 %s422_s6, 4 }
   0xe   : > { %s144_s13 = scalar_lea.vmem %s415_s0, %s322_s10  ;;  %s154_s16 = scalar_lea.vmem %s416_s1, %s322_s10 }
   0xf   : > { %v348_v0 = vld [vmem:[%s144_s13 + $0x4] ss:$8 sps:$4 sm:$0x7f]   ;;  %v350_v1 = vld [vmem:[%s144_s13] ss:$8 sps:$4 sm:$0x7f]  }
  0x10   : > { %v173_v2 = vsel %vm167_vm0, %v348_v0, 1065369472  ;;  %v170_v3 = vsel %vm167_vm0, %v350_v1, 1065369472 }
  0x11   : > { %189 = vmatprep.subr.bf16.mxu0 %v173_v2  ;;  %207 = vmatprep.mubr.bf16.mxu0 %v173_v2 }
  0x12   : > { %190 = vmatpush1.bf16.xpose.msra.mxu0 %v170_v3 }
  0x19   : > { %208 = vmatmul.mubr.bf16.vlgmr.msra.gmra.mxu0 %v170_v3 }
  0xd9   : > { %v209_v4 = vpop.f32.mrf.mxu0 }
  0xda   : > { %217 = vst.msk [vmem:[%s154_s16] sm:$0xff] %vm216_vm1, %v209_v4 }
  0xdb   : > { %v211_v5 = vpop.f32.mrf.mxu0 }
  0xdd   : > { %v212_v6 = vpop.f32.mrf.mxu0 }
  0xde   : > { %219 = vst.msk [vmem:[%s154_s16 + $0x8] sm:$0x7f] %vm218_vm2, %v212_v6 }
  0xdf   : > { %v214_v7 = vpop.f32.mrf.mxu0 }
  0xe0 PF: > { %s11_s8 = sadd.s32 1, %s373_s8   ;;  %s417_s6 = smov %s369_s7 }
  0xe1   : > { %p8_p5 = scmp.ge.s32.totalorder %s11_s8, 4   ;;  %s418_s7 = smov %s420_s9 }
  0xe3   :  { %10 = sbr.rel (!%p8_p5) target bundleno = 2 (0x2), region = 54 }

// kernel: overlap_patch_embed.3
= control target key start
LH: loop header
LB: loop body
LE: loop exit
PB: predicated region body
PF: predicated region fallthrough
CT: control target
= control target key end

     0   :  { %8 = vsyncpa [#allocation3], 0  ;;  %s945_s0 = inlined_call_operand.vmem [shape: bf16[2,14,256], index: 0, kind: input, shape index: {}]   ;;  %s946_s1 = inlined_call_operand.vmem [shape: bf16[64,14], index: 1, kind: input, shape index: {}]   ;;  %s947_s2 = inlined_call_operand.vmem [shape: f32[64,2], index: 2, kind: input, shape index: {}]   ;;  %s948_s3 = inlined_call_operand.hbm [shape: f32[2,64,256], index: 3, kind: output, shape index: {}]  }
   0x1   :  { %10 = vsyncpa [#allocation3 + $0x1], 0  ;;  %s756_s12 = smov 0   ;;  %s758_s13 = smov 0  }
   0x2   :  { %s760_s14 = smov 0   ;;  %s762_s15 = smov 0  }
   0x3   :  { %s764_s16 = smov 0   ;;  %s766_s17 = smov 0  }
   0x4 LB: > { %s555_s18 = sadd.s32 4294967295, %s729_s17   ;;  %s556_s19 = sadd.s32 4294967294, %s729_s17   ;;  %s729_s17 = sphi %s766_s17, %s16_s17   ;;  %s725_s16 = sphi %s764_s16, %s955_s16   ;;  %s721_s15 = sphi %s762_s15, %s954_s15   ;;  %s717_s14 = sphi %s760_s14, %s953_s14   ;;  %s713_s13 = sphi %s758_s13, %s952_s13   ;;  %s709_s12 = sphi %s756_s12, %s951_s12  }
   0x5   : > { %s28_s20 = sadd.s32 1, %s725_s16  ;;  %s107_s21 = sadd.s32 1, %s717_s14 }
   0x6   : > { %p30_p0 = scmp.ge.s32.totalorder %s28_s20, 2  ;;  %p117_p1 = scmp.ne.s32.totalorder %s717_s14, %s713_s13 }
   0x7   : > { %p118_p2 = scmp.eq.s32.totalorder %s555_s18, 1  ;;  %p123_p3 = scmp.ne.s32.totalorder %s713_s13, %s709_s12 }
   0x8   : > { %s957_s20 = smov (%p30_p0, %s28_s20), 0  ;;  %p124_p5 = scmp.eq.s32.totalorder %s556_s19, 1 }
   0x9   : > { %p796_p4 = por %p118_p2, %p117_p1  ;;  %s102_s23 = ssub.s32 %s725_s16, %s957_s20 }
   0xa   : > { %p559_p6 = scmp.ge.s32.totalorder %s729_s17, 1  ;;  %p105_p7 = scmp.eq.s32.totalorder %s102_s23, 0 }
   0xb   : > { %p803_p8 = por %p124_p5, %p123_p3  ;;  %p161_p9 = scmp.lt.s32.totalorder %s729_s17, 3 }
   0xc   : > { %s809_s25 = scalar_select %p105_p7, %s717_s14, %s107_s21  }
   0xd   : > { %p162_p10 = pnand %p559_p6, %p161_p9 }
   0xe   : > { %p190_p11 = scmp.lt.s32.totalorder (!%p162_p10), %s721_s15, 1  ;;  %s186_s11 = sand.u32 (!%p162_p10), 1, %s713_s13  }
   0xf   : > { %165 = sbr.rel (%p162_p10) target bundleno = 254 (0xfe), region = 32  ;;  %s560_s18 = sshll.u32 (!%p162_p10), %s186_s11, 7 }
  0x10   : > { %s865_s19 = scalar_lea.vmem (!%p162_p10), [#allocation2], %s560_s18  ;;  %s580_s21 = sshll.u32 (!%p162_p10), %s721_s15, 11 }
  0x11   : > { %s476_s23 = sshll.u32 (!%p162_p10), %s865_s19, 4  ;;  %s900_s28 = scalar_lea.sflag (!%p162_p10), [#allocation3], %s186_s11  ;;  %s891_s23 = int_to_ptr.vmem [resolvable:$true] %s476_s23 }
  0x12   : > { %s653_s29 = scalar_lea.vmem (!%p162_p10), %s891_s23, 2048  ;;  %s733_s30 = smov (!%p162_p10), [#allocation2]  }
  0x13   : > { %p654_p12 = scmp.ne.s32.totalorder (!%p162_p10), %s891_s23, %s653_s29  ;;  %s657_s4 = sshll.u32 (!%p162_p10), %s733_s30, 4  ;;  %s658_s4 = int_to_ptr.vmem [resolvable:$false] %s657_s4 }
  0x14   : > { %v731_v0 = vmov 0   ;;  %s191_s26 = scalar_select %p190_p11, %s721_s15, 1  ;;  %v334_v1 = vld [vmem:[%s947_s2 + $0x10] sm:$0xff]  ;;  %v332_v2 = vld [vmem:[%s947_s2] sm:$0xff]  ;;  %vm252_vm0 = vcmask 1046528   ;;  %v335_v3 = vld [vmem:[%s947_s2 + $0x18] sm:$0xff] }
  0x15   : > { %291 = vmatprep.mubr.bf16.mxu0 %v731_v0  ;;  %311 = vmatprep.mubr.bf16.mxu1 %v731_v0  ;;  %v333_v4 = vld [vmem:[%s947_s2 + $0x8] sm:$0xff]  ;;  %v649_v8 = vld [vmem:[%s946_s1] sm:$0xff]   ;;  %v650_v9 = vld [vmem:[%s946_s1 + $0x10] sm:$0xff]   ;;  %vm239_vm1 = vcmask 113664   ;;  %v732_v16 = vmov 1   ;;  %s889_s15 = scalar_lea.hbm %s948_s3, %s580_s21  ;;  %p655_p13 = pnand %p654_p12, %p796_p4 }
  0x16   : > { %643 = vset.pattern.permute.xlu1 %v731_v0  ;;  %642 = vset.pattern.permute.xlu0 %v731_v0  ;;  %s579_s27 = sshll.u32 %s191_s26, 4  ;;  %v337_v10 = vld [vmem:[%s947_s2 + $0x28] sm:$0xff]  ;;  %v336_v11 = vld [vmem:[%s947_s2 + $0x20] sm:$0xff]  ;;  %v339_v12 = vld [vmem:[%s947_s2 + $0x38] sm:$0xff]  ;;  %s659_s5 = scalar_lea.vmem %s658_s4, 4096 }
  0x17   : > { %s197_s7 = scalar_lea.vmem %s945_s0, %s579_s27  ;;  %352 = vperm.xlu1 %643, %v334_v1   ;;  %342 = vperm.xlu0 %642, %v332_v2   ;;  %v338_v13 = vld [vmem:[%s947_s2 + $0x30] sm:$0xff]  ;;  %v651_v14 = vld [vmem:[%s946_s1 + $0x8] sm:$0xff]   ;;  %v652_v15 = vld [vmem:[%s946_s1 + $0x18] sm:$0xff]   ;;  %p656_p0 = pneg %p655_p13 }
  0x18   : > { %v646_v5 = vld [vmem:[%s197_s7 + $0x4] ss:$8 sps:$4 sm:$0x7f]   ;;  %v648_v6 = vld [vmem:[%s197_s7] ss:$8 sps:$4 sm:$0x7f]   ;;  %p660_p1 = scmp.lt.s32.totalorder %s891_s23, %s658_s4  ;;  %p661_p2 = scmp.lt.s32.totalorder %s659_s5, %s653_s29 }
  0x19   : > { %569 = vmatprep.subr.msk.bf16.mxu0 %vm252_vm0, %v646_v5  ;;  %581 = vmatprep.subr.msk.bf16.mxu1 %vm252_vm0, %v646_v5  ;;  %v254_v7 = vsel %vm252_vm0, %v648_v6, 0 }
  0x1a   : > { %274 = vmatpush1.bf16.msra.mxu0 %v254_v7  ;;  %582 = vmatpush1.bf16.msra.mxu1 %v254_v7  ;;  %p662_p3 = por %p661_p2, %p660_p1 }
  0x1b   : > { %357 = vperm.xlu1 %643, %v335_v3   ;;  %347 = vperm.xlu0 %642, %v333_v4  }
  0x1c   : > { %p663_p5 = pnand %p662_p3, %p656_p0 }
  0x1d   : > { %570 = vmatmul.mubr.msk.bf16.vlgmr.msra.gmra.mxu0 %vm239_vm1, %v649_v8  ;;  %572 = vmatmul.mubr.msk.bf16.vlgmr.msra.gmra.mxu1 %vm239_vm1, %v650_v9 }
  0x1e   : > { %301 = vmatprep.mubr.bf16.mxu0 %v731_v0  ;;  %321 = vmatprep.mubr.bf16.mxu1 %v731_v0 }
  0x1f   : > { %367 = vperm.xlu1 %643, %v337_v10   ;;  %362 = vperm.xlu0 %642, %v336_v11  }
  0x23   : > { %377 = vperm.xlu1 %643, %v339_v12   ;;  %372 = vperm.xlu0 %642, %v338_v13  }
  0x25   : > { %571 = vmatmul.mubr.msk.bf16.gmra.mxu0 %vm239_vm1, %v651_v14  ;;  %573 = vmatmul.mubr.msk.bf16.gmra.mxu1 %vm239_vm1, %v652_v15 }
  0x27   : > { %645 = vset.pattern.permute.xlu1 %v732_v16  ;;  %644 = vset.pattern.permute.xlu0 %v732_v16 }
  0x28   : > { %401 = vperm.xlu1 %645, %v333_v4   ;;  %397 = vperm.xlu0 %644, %v332_v2  }
  0x2c   : > { %405 = vperm.xlu1 %645, %v334_v1   ;;  %409 = vperm.xlu0 %644, %v335_v3  }
  0x30   : > { %413 = vperm.xlu1 %645, %v336_v11   ;;  %417 = vperm.xlu0 %644, %v337_v10  }
  0x34   : > { %421 = vperm.xlu1 %645, %v338_v13   ;;  %425 = vperm.xlu0 %644, %v339_v12  }
  0x92   : > { %v353_v17 = vpop.permute.xlu1 %352  ;;  %v343_v18 = vpop.permute.xlu0 %342 }
  0x96   : > { %v856_v19 = vpop.permute.xlu1 %357  ;;  %v348_v20 = vpop.permute.xlu0 %347 }
  0x9a   : > { %v368_v21 = vpop.permute.xlu1 %367  ;;  %v363_v22 = vpop.permute.xlu0 %362 }
  0x9e   : > { %v858_v23 = vpop.permute.xlu1 %377  ;;  %v373_v24 = vpop.permute.xlu0 %372 }
  0xa3   : > { %v402_v25 = vpop.permute.xlu1 %401  ;;  %v398_v26 = vpop.permute.xlu0 %397 }
  0xa7   : > { %v406_v27 = vpop.permute.xlu1 %405  ;;  %v861_v28 = vpop.permute.xlu0 %409 }
  0xab   : > { %v414_v31 = vpop.permute.xlu1 %413  ;;  %v418_v42 = vpop.permute.xlu0 %417 }
  0xaf   : > { %v422_v55 = vpop.permute.xlu1 %421  ;;  %v426_v4 = vpop.permute.xlu0 %425 }
  0xdd   : > { %v293_v29 = vpop.f32.mrf.mxu0  ;;  %v313_v30 = vpop.f32.mrf.mxu1 }
  0xde   : > { %v380_v32 = vmul.f32 %v343_v18, %v293_v29  ;;  %v388_v33 = vmul.f32 %v363_v22, %v313_v30 }
  0xdf   : > { %v295_v34 = vpop.f32.mrf.mxu0  ;;  %v315_v35 = vpop.f32.mrf.mxu1 }
  0xe0   : > { %v428_v36 = vadd.f32 %v398_v26, %v380_v32  ;;  %v436_v37 = vadd.f32 %v414_v31, %v388_v33  ;;  %v381_v38 = vmul.f32 %v343_v18, %v295_v34  ;;  %v389_v39 = vmul.f32 %v363_v22, %v315_v35 }
  0xe1   : > { %v297_v40 = vpop.f32.mrf.mxu0  ;;  %v317_v41 = vpop.f32.mrf.mxu1 }
  0xe2   : > { %444 = vst [vmem:[%s865_s19] sm:$0xff] %v428_v36  ;;  %452 = vst [vmem:[%s865_s19 + $0x40] sm:$0xff] %v436_v37  ;;  %v429_v43 = vadd.f32 %v398_v26, %v381_v38  ;;  %v437_v44 = vadd.f32 %v414_v31, %v389_v39  ;;  %v382_v45 = vmul.f32 %v348_v20, %v297_v40 }
  0xe3   : > { %v390_v46 = vmul.f32 %v368_v21, %v317_v41  ;;  %v299_v47 = vpop.f32.mrf.mxu0  ;;  %v319_v48 = vpop.f32.mrf.mxu1 }
  0xe4   : > { %445 = vst [vmem:[%s865_s19 + $0x8] sm:$0xff] %v429_v43  ;;  %453 = vst [vmem:[%s865_s19 + $0x48] sm:$0xff] %v437_v44  ;;  %v430_v49 = vadd.f32 %v402_v25, %v382_v45  ;;  %v383_v51 = vmul.f32 %v348_v20, %v299_v47  ;;  %v391_v52 = vmul.f32 %v368_v21, %v319_v48 }
  0xe5   : > { %v438_v50 = vadd.f32 %v418_v42, %v390_v46  ;;  %v303_v53 = vpop.f32.mrf.mxu0  ;;  %v323_v54 = vpop.f32.mrf.mxu1 }
  0xe6   : > { %446 = vst [vmem:[%s865_s19 + $0x10] sm:$0xff] %v430_v49  ;;  %v431_v56 = vadd.f32 %v402_v25, %v383_v51  ;;  %v439_v57 = vadd.f32 %v418_v42, %v391_v52  ;;  %v384_v58 = vmul.f32 %v353_v17, %v303_v53  ;;  %v392_v59 = vmul.f32 %v373_v24, %v323_v54 }
  0xe7   : > { %454 = vst [vmem:[%s865_s19 + $0x50] sm:$0xff] %v438_v50  ;;  %v305_v60 = vpop.f32.mrf.mxu0  ;;  %v325_v61 = vpop.f32.mrf.mxu1 }
  0xe8   : > { %447 = vst [vmem:[%s865_s19 + $0x18] sm:$0xff] %v431_v56  ;;  %455 = vst [vmem:[%s865_s19 + $0x58] sm:$0xff] %v439_v57  ;;  %v432_v62 = vadd.f32 %v406_v27, %v384_v58  ;;  %v440_v63 = vadd.f32 %v422_v55, %v392_v59  ;;  %v385_v0 = vmul.f32 %v353_v17, %v305_v60 }
  0xe9   : > { %v393_v1 = vmul.f32 %v373_v24, %v325_v61  ;;  %v307_v2 = vpop.f32.mrf.mxu0  ;;  %v327_v3 = vpop.f32.mrf.mxu1 }
  0xea   : > { %448 = vst [vmem:[%s865_s19 + $0x20] sm:$0xff] %v432_v62  ;;  %456 = vst [vmem:[%s865_s19 + $0x60] sm:$0xff] %v440_v63  ;;  %v433_v5 = vadd.f32 %v406_v27, %v385_v0  ;;  %v386_v7 = vmul.f32 %v856_v19, %v307_v2  ;;  %v394_v8 = vmul.f32 %v858_v23, %v327_v3 }
  0xeb   : > { %v441_v6 = vadd.f32 %v422_v55, %v393_v1  ;;  %v309_v9 = vpop.f32.mrf.mxu0  ;;  %v329_v10 = vpop.f32.mrf.mxu1 }
  0xec   : > { %449 = vst [vmem:[%s865_s19 + $0x28] sm:$0xff] %v433_v5  ;;  %v434_v11 = vadd.f32 %v861_v28, %v386_v7  ;;  %v442_v12 = vadd.f32 %v426_v4, %v394_v8  ;;  %v387_v13 = vmul.f32 %v856_v19, %v309_v9  ;;  %v395_v14 = vmul.f32 %v858_v23, %v329_v10 }
  0xed   : > { %457 = vst [vmem:[%s865_s19 + $0x68] sm:$0xff] %v441_v6 }
  0xee   : > { %450 = vst [vmem:[%s865_s19 + $0x30] sm:$0xff] %v434_v11  ;;  %458 = vst [vmem:[%s865_s19 + $0x70] sm:$0xff] %v442_v12  ;;  %v435_v15 = vadd.f32 %v861_v28, %v387_v13  ;;  %v443_v16 = vadd.f32 %v426_v4, %v395_v14 }
  0xf0   : > { %451 = vst [vmem:[%s865_s19 + $0x38] sm:$0xff] %v435_v15  ;;  %459 = vst [vmem:[%s865_s19 + $0x78] sm:$0xff] %v443_v16 }
  0xf1   : > { %666 = shalt.err (!%p663_p5)
}
  0xf2   : > { %s667_s6 = scalar_lea.hbm %s889_s15, 2048  ;;  %s671_s9 = scalar_lea.hbm %s948_s3, 4096 }
  0xf3   : > { %p668_p6 = scmp.ne.s32.totalorder %s889_s15, %s667_s6  ;;  %p672_p10 = scmp.lt.s32.totalorder %s889_s15, %s948_s3 }
  0xf4   : > { %p673_p11 = scmp.lt.s32.totalorder %s671_s9, %s667_s6 }
  0xf5   : > { %p669_p7 = pnand %p668_p6, %p796_p4 }
  0xf6   : > { %p674_p12 = por %p673_p11, %p672_p10 }
  0xf7   : > { %p670_p9 = pneg %p669_p7 }
  0xf9   : > { %p675_p13 = pnand %p674_p12, %p670_p9 }
  0xfb   : > { %678 = shalt.err (!%p675_p13)
}
  0xfc   : > { %s734_s18 = smov 256   ;;  %s735_s19 = smov 16  }
  0xfd   : > { %583 = dma.vmem_to_hbm [thread:$0]  (%p796_p4), %s891_s23, 2048, %s889_s15, %s900_s28, %s734_s18, %s734_s18, %s735_s19  }
  0xfe PF: > { %p589_p0 = scmp.ge.s32.totalorder %s729_s17, 2  ;;  %s491_s21 = sand.u32 1, %s709_s12  }
  0xff   : > { %s492_s26 = scalar_lea.sflag [#allocation3], %s491_s21 }
 0x100   : > { %p586_p1 = pnand %p589_p0, %p803_p8 }
 0x102   : > { %p587_p2 = pneg %p586_p1 }
 0x104   : > { %704 = dma.done.wait (%p587_p2), %s492_s26, 2048  }
 0x105   : > { %706 = vsyncadd (%p587_p2), %s492_s26, 4294965248  ;;  %s16_s17 = sadd.s32 1, %s729_s17   ;;  %s951_s12 = smov %s713_s13 }
 0x106   : > { %p13_p3 = scmp.ge.s32.totalorder %s16_s17, 4   ;;  %s952_s13 = smov %s717_s14 }
 0x107   : > { %s953_s14 = smov %s809_s25  ;;  %s954_s15 = smov %s725_s16 }
 0x108   : > { %s955_s16 = smov %s957_s20  ;;  %15 = sbr.rel (!%p13_p3) target bundleno = 4 (0x4), region = 67 }
 0x10d   :  { %497 = vsyncpa [#allocation3], 1 }
 0x10e   :  { %499 = vsyncpa [#allocation3 + $0x1], 1 }

</bundles_post_ra>
